<compile_context>
chip_gen: v5e
topology: v5e:2x2
jax: 0.10.0
libtpu: 0.0.40
codegen_flags: <defaults>
</compile_context>

<pallas_src>
import jax
import jax.numpy as jnp
from jax.experimental import pallas as pl
from jax.experimental.pallas import tpu as pltpu

N_VERT = 256            # synthetic vertex count (real BFM has ~28k)
N_ID = 30
N_EXP = 20
K = N_ID + N_EXP        # 50 PCA coefficients
K_ROWS = K + 1          # + 1 row holding the folded mean
K_PAD = 56              # pad contraction rows to the next multiple of 8
N_LM = 68               # number of landmarks
LM_PAD = 128            # landmarks padded to one full lane tile
D_FULL = 3 * N_VERT     # coordinate-major full face: [x.. | y.. | z..]
D_LM = 3 * LM_PAD       # coordinate-major landmark slab
D_TOT = D_FULL + D_LM   # 768 + 384 = 1152  (multiple of 128)


# ---------------------------------------------------------------------------
# The single fused kernel
# ---------------------------------------------------------------------------
def _fused_net_kernel(params_ref, coeff_ref, basis_ref, out_ref):
    f32 = jnp.float32

    # ---- morphable model: face = coeff @ basis (mu folded as row K) --------
    # (1, K_PAD) bf16 @ (K_PAD, D_TOT) bf16 on the MXU, f32 accumulation;
    # result is lane-dense (D_TOT = 9 * 128).
    face = jnp.dot(coeff_ref[...].astype(jnp.bfloat16), basis_ref[...],
                   preferred_element_type=f32)                 # (1, D_TOT) f32

    # ---- frustum bounds from the (model-space) full face --------------------
    fx = face[:, 0 * N_VERT:1 * N_VERT]
    fy = face[:, 1 * N_VERT:2 * N_VERT]
    fz = face[:, 2 * N_VERT:3 * N_VERT]
    l_ = jnp.min(fx, axis=1, keepdims=True)      # (1, 1) each
    r_ = jnp.max(fx, axis=1, keepdims=True)
    b_ = jnp.min(fy, axis=1, keepdims=True)
    t_ = jnp.max(fy, axis=1, keepdims=True)
    n_ = jnp.min(fz, axis=1, keepdims=True)
    f_ = jnp.max(fz, axis=1, keepdims=True)

    # ---- R / T from SMEM scalars: pure scalar-unit arithmetic ---------------
    cx, sx = params_ref[0], params_ref[1]
    cy, sy = params_ref[2], params_ref[3]
    cz, sz = params_ref[4], params_ref[5]
    tx, ty, tz = params_ref[6], params_ref[7], params_ref[8]

    Rx = [[1.0, 0.0, 0.0], [0.0, cx, -sx], [0.0, sx, cx]]
    Ry = [[cy, 0.0, sy], [0.0, 1.0, 0.0], [-sy, 0.0, cy]]
    Rz = [[cz, -sz, 0.0], [sz, cz, 0.0], [0.0, 0.0, 1.0]]

    def mat3(A, B):
        return [[sum(A[i][k] * B[k][j] for k in range(3)) for j in range(3)]
                for i in range(3)]

    R = mat3(Rz, mat3(Ry, Rx))                   # Rz @ (Ry @ Rx), scalars

    T = [[R[0][0], R[0][1], R[0][2], tx],
         [R[1][0], R[1][1], R[1][2], ty],
         [R[2][0], R[2][1], R[2][2], tz],
         [0.0, 0.0, 0.0, 1.0]]

    # ---- P / V / pi / M: depend on vector min/max -> stay as (1,1) vregs ----
    P = [[2.0 * n_ / (r_ - l_), 0.0, (r_ + l_) / (r_ - l_), 0.0],
         [0.0, 2.0 * n_ / (t_ - b_), (t_ + b_) / (t_ - b_), 0.0],
         [0.0, 0.0, -((f_ + n_) / (f_ - n_)), -(2.0 * f_ * n_ / (f_ - n_))],
         [0.0, 0.0, -1.0, 0.0]]
    V = [[(r_ - l_) * 0.5, 0.0, 0.0, (r_ + l_) * 0.5],
         [0.0, (t_ - b_) * 0.5, 0.0, (t_ + b_) * 0.5],
         [0.0, 0.0, 0.5, 0.5],
         [0.0, 0.0, 0.0, 1.0]]

    def row4(vec, Mat):          # (1x4 row) @ (4x4); entries scalar or (1,1)
        return [sum(vec[k] * Mat[k][j] for k in range(4)) for j in range(4)]

    pi0 = row4(V[0], P)          # rows 0/1 of pi = V @ P (pred keeps x,y only)
    pi1 = row4(V[1], P)
    M0 = row4(pi0, T)            # rows 0/1 of M = pi @ T
    M1 = row4(pi1, T)

    # ---- project ONLY the (lane-padded) landmark vertices -------------------
    # No perspective divide, exactly like the reference: pi @ T @ [x;y;z;1].
    xl = face[:, D_FULL + 0 * LM_PAD:D_FULL + 1 * LM_PAD]
    yl = face[:, D_FULL + 1 * LM_PAD:D_FULL + 2 * LM_PAD]
    zl = face[:, D_FULL + 2 * LM_PAD:D_FULL + 3 * LM_PAD]

    out_ref[0:1, :] = M0[0] * xl + M0[1] * yl + M0[2] * zl + M0[3]
    out_ref[1:2, :] = M1[0] * xl + M1[1] * yl + M1[2] * zl + M1[3]


def _fused_net_call(params, coeff, basis_all):
    return pl.pallas_call(
        _fused_net_kernel,
        out_shape=jax.ShapeDtypeStruct((2, LM_PAD), jnp.float32),
        grid=(1,),
        in_specs=[
            pl.BlockSpec(memory_space=pltpu.MemorySpace.SMEM),    # params (16,)
            pl.BlockSpec((1, K_PAD), lambda i: (0, 0)),           # coeff row
            pl.BlockSpec((K_PAD, D_TOT), lambda i: (0, 0)),       # bf16 basis+mu
        ],
        out_specs=pl.BlockSpec((2, LM_PAD), lambda i: (0, 0)),
        compiler_params=pltpu.CompilerParams(
            dimension_semantics=("arbitrary",)),
    )(params, coeff, basis_all)


# ---------------------------------------------------------------------------
# One-time static relayout of the BFM tensors (NOT on the per-call path)
# ---------------------------------------------------------------------------
def prepare_bfm(bfm, lm_idx):
    """Returns basis_all (K_PAD, D_TOT) bf16:
    id+exp PCA bases (with sqrt(var) folded into the columns) concatenated
    along K, plus the mean as row K, coordinate-major with vertices on the
    lane axis, followed by a lane-padded copy of the 68 landmark columns."""
    id_b = bfm["id_basis"] * jnp.sqrt(bfm["id_var"])[None, None, :]
    exp_b = bfm["exp_basis"] * jnp.sqrt(bfm["exp_var"])[None, None, :]
    basis = jnp.concatenate([id_b, exp_b], axis=-1)                 # (N,3,K)
    mu = bfm["id_mu"] + bfm["exp_mu"]                               # (N,3)
    basis = jnp.concatenate([basis, mu[:, :, None]], axis=-1)       # (N,3,K+1)

    basis_full = jnp.transpose(basis, (2, 1, 0)).reshape(K_ROWS, D_FULL)

    basis_lm = jnp.pad(basis[lm_idx], ((0, LM_PAD - N_LM), (0, 0), (0, 0)))
    basis_lm = jnp.transpose(basis_lm, (2, 1, 0)).reshape(K_ROWS, D_LM)

    basis_all = jnp.concatenate([basis_full, basis_lm], axis=1)     # (K+1, D_TOT)
    basis_all = jnp.pad(basis_all, ((0, K_PAD - K_ROWS), (0, 0)))   # (K_PAD, D_TOT)
    return basis_all.astype(jnp.bfloat16)


# ---------------------------------------------------------------------------
# Per-call forward (== Net.forward): tiny parameter prep + fused kernel
# ---------------------------------------------------------------------------
@jax.jit
def net_forward(basis_all, alpha, delta, omega, tau):
    # sqrt(var) is folded into the basis; the mean rides as component K.
    coeff = jnp.concatenate([alpha, delta, jnp.ones((1,), jnp.float32)])
    coeff = jnp.pad(coeff, (0, K_PAD - K_ROWS)).reshape(1, K_PAD)
    coeff = coeff.astype(jnp.float32)

    # Only sin/cos of the 3 Euler angles is done here (scalar transcendentals
    # don't lower onto the TPU scalar core); all matrix math is in-kernel.
    ang = omega * (jnp.pi / 180.0)
    c, s = jnp.cos(ang), jnp.sin(ang)
    params = jnp.concatenate([
        jnp.stack([c[0], s[0], c[1], s[1], c[2], s[2]]),
        tau.astype(jnp.float32),
        jnp.zeros((7,), jnp.float32),
    ]).astype(jnp.float32)                                          # (16,)

    out = _fused_net_call(params, coeff, basis_all)                 # (2, LM_PAD)
    return out[:, :N_LM].T                                          # (68, 2)


# ---------------------------------------------------------------------------
# Pure-JAX mirror of the PyTorch reference (for numerical verification)
# ---------------------------------------------------------------------------
def _mm(a, b):
    return jnp.matmul(a, b, precision="highest")


def _rotation_matrix_ref(omega_deg):
    o = omega_deg * (jnp.pi / 180.0)
    cx, sx = jnp.cos(o[0]), jnp.sin(o[0])
    cy, sy = jnp.cos(o[1]), jnp.sin(o[1])
    cz, sz = jnp.cos(o[2]), jnp.sin(o[2])
    one, zero = jnp.ones(()), jnp.zeros(())
    Rx = jnp.stack([jnp.stack([one, zero, zero]),
                    jnp.stack([zero, cx, -sx]),
                    jnp.stack([zero, sx, cx])])
    Ry = jnp.stack([jnp.stack([cy, zero, sy]),
                    jnp.stack([zero, one, zero]),
                    jnp.stack([-sy, zero, cy])])
    Rz = jnp.stack([jnp.stack([cz, -sz, zero]),
                    jnp.stack([sz, cz, zero]),
                    jnp.stack([zero, zero, one])])
    return _mm(Rz, _mm(Ry, Rx))


def _pinhole_ref(face, omega, tau):
    R = _rotation_matrix_ref(omega)
    T = jnp.concatenate([R, tau[:, None]], axis=1)
    T = jnp.concatenate([T, jnp.array([[0., 0., 0., 1.]], jnp.float32)], axis=0)

    l, r = jnp.min(face[:, 0]), jnp.max(face[:, 0])
    b, t = jnp.min(face[:, 1]), jnp.max(face[:, 1])
    n, f = jnp.min(face[:, 2]), jnp.max(face[:, 2])
    zero, one, half = jnp.zeros(()), jnp.ones(()), jnp.full((), 0.5)

    P = jnp.stack([
        jnp.stack([2 * n / (r - l), zero, (r + l) / (r - l), zero]),
        jnp.stack([zero, 2 * n / (t - b), (t + b) / (t - b), zero]),
        jnp.stack([zero, zero, -((f + n) / (f - n)), -(2 * f * n / (f - n))]),
        jnp.stack([zero, zero, -one, zero]),
    ])
    V = jnp.stack([
        jnp.stack([(r - l) / 2, zero, zero, (r + l) / 2]),
        jnp.stack([zero, (t - b) / 2, zero, (t + b) / 2]),
        jnp.stack([zero, zero, half, half]),
        jnp.stack([zero, zero, zero, one]),
    ])
    pi_m = _mm(V, P)
    ones_col = jnp.ones((face.shape[0], 1), jnp.float32)
    face_h = jnp.concatenate([face, ones_col], axis=1)      # (N, 4)
    cam = _mm(T, face_h.T)                                  # (4, N)
    return _mm(pi_m, cam).T[:, :3]                          # (N, 3)


def net_forward_ref(bfm, alpha, delta, omega, tau, lm_idx):
    face = (bfm["id_mu"]
            + jnp.einsum("vck,k->vc", bfm["id_basis"],
                         jnp.sqrt(bfm["id_var"]) * alpha, precision="highest")
            + bfm["exp_mu"]
            + jnp.einsum("vck,k->vc", bfm["exp_basis"],
                         jnp.sqrt(bfm["exp_var"]) * delta, precision="highest"))
    face_2d = _pinhole_ref(face, omega, tau)
    return face_2d[lm_idx][:, :2]


# ---------------------------------------------------------------------------
if __name__ == "__main__":
    key = jax.random.PRNGKey(0)
    ks = jax.random.split(key, 8)

    # Synthetic, deterministic stand-in for the BFM h5 model.
    bfm = {
        "id_mu": jax.random.normal(ks[0], (N_VERT, 3), jnp.float32) * 50.0,
        "id_basis": jax.random.normal(ks[1], (N_VERT, 3, N_ID), jnp.float32),
        "id_var": jnp.abs(jax.random.normal(ks[2], (N_ID,), jnp.float32)) + 0.1,
        "exp_mu": jax.random.normal(ks[3], (N_VERT, 3), jnp.float32) * 5.0,
        "exp_basis": jax.random.normal(ks[4], (N_VERT, 3, N_EXP), jnp.float32),
        "exp_var": jnp.abs(jax.random.normal(ks[5], (N_EXP,), jnp.float32)) + 0.1,
    }

    # Module parameters (Net.__init__): omega, tau, alpha ~ U, delta ~ U.
    omega = jnp.array([0.0, 10.0, 0.0], jnp.float32)
    tau = jnp.array([0.0, 0.0, -400.0], jnp.float32)
    alpha = jax.random.uniform(ks[6], (N_ID,), jnp.float32, minval=-1.0, maxval=1.0)
    delta = jax.random.uniform(ks[7], (N_EXP,), jnp.float32, minval=-1.0, maxval=1.0)

    # TODO(synk): landmark indices normally come from Landmarks68_*.anl; use
    # deterministic in-script indices instead of reading the file.
    lm_idx = (jnp.arange(N_LM) * (N_VERT // N_LM)).astype(jnp.int32)

    # One-time static relayout (at real BFM scale this is done once, offline).
    basis_all = prepare_bfm(bfm, lm_idx)

    pred = net_forward(basis_all, alpha, delta, omega, tau)
    pred = jax.block_until_ready(pred)
    assert pred.shape == (N_LM, 2) and pred.dtype == jnp.float32

    # Numerical check against a pure-JAX f32 mirror of the PyTorch reference
    # (tolerance absorbs the bf16 basis storage).
    ref = net_forward_ref(bfm, alpha, delta, omega, tau, lm_idx)
    rel_err = float(jnp.max(jnp.abs(pred - ref)) / (jnp.max(jnp.abs(ref)) + 1e-6))
    assert rel_err < 5e-2, f"relative error too large: {rel_err}"

    print("KERNEL_OK")
</pallas_src>

<mosaic_0001>
module attributes {stable_mosaic.version = 11 : i64} {
  func.func @_fused_net_kernel(%arg0: i32, %arg1: memref<16xf32, #tpu.memory_space<smem>>, %arg2: memref<1x56xf32, #tpu.memory_space<vmem>>, %arg3: memref<56x1152xbf16, #tpu.memory_space<vmem>>, %arg4: memref<2x128xf32, #tpu.memory_space<vmem>>) attributes {dimension_semantics = [#tpu.dimension_semantics<arbitrary>], iteration_bounds = array<i64: 1>, scalar_prefetch = 0 : i64, scratch_operands = 0 : i64, tpu.core_type = #tpu.core_type<tc>, window_params = [{transform_indices = @transform_0, window_bounds = array<i64: 16>}, {pipeline_mode = #tpu.pipeline_mode<synchronous>, transform_indices = @transform_1, window_bounds = array<i64: 1, 56>}, {pipeline_mode = #tpu.pipeline_mode<synchronous>, transform_indices = @transform_2, window_bounds = array<i64: 56, 1152>}, {pipeline_mode = #tpu.pipeline_mode<synchronous>, transform_indices = @transform_3, window_bounds = array<i64: 2, 128>}]} {
    %c0 = arith.constant 0 : index
    %c0_0 = arith.constant 0 : index
    %0 = vector.load %arg2[%c0, %c0_0] : memref<1x56xf32, #tpu.memory_space<vmem>>, vector<1x56xf32>
    %1 = arith.truncf %0 : vector<1x56xf32> to vector<1x56xbf16>
    %c0_1 = arith.constant 0 : index
    %c0_2 = arith.constant 0 : index
    %2 = vector.load %arg3[%c0_1, %c0_2] : memref<56x1152xbf16, #tpu.memory_space<vmem>>, vector<56x1152xbf16>
    %cst = arith.constant dense<0.000000e+00> : vector<1x1152xf32>
    %3 = tpu.matmul %1, %2, %cst {dimension_numbers = #tpu.dot_dimension_numbers<[1], [0], [0], [1], [0, 0, 1, 1], [], []>} : vector<1x56xbf16>, vector<56x1152xbf16>, vector<1x1152xf32> -> vector<1x1152xf32>
    %4 = vector.extract_strided_slice %3 {offsets = [0, 0], sizes = [1, 256], strides = [1, 1]} : vector<1x1152xf32> to vector<1x256xf32>
    %5 = vector.extract_strided_slice %3 {offsets = [0, 256], sizes = [1, 256], strides = [1, 1]} : vector<1x1152xf32> to vector<1x256xf32>
    %6 = vector.extract_strided_slice %3 {offsets = [0, 512], sizes = [1, 256], strides = [1, 1]} : vector<1x1152xf32> to vector<1x256xf32>
    %cst_3 = arith.constant dense<0x7F800000> : vector<1xf32>
    %7 = vector.multi_reduction <minimumf>, %4, %cst_3 [1] : vector<1x256xf32> to vector<1xf32>
    %8 = vector.shape_cast %7 : vector<1xf32> to vector<1x1xf32>
    %cst_4 = arith.constant dense<0xFF800000> : vector<1xf32>
    %9 = vector.multi_reduction <maximumf>, %4, %cst_4 [1] : vector<1x256xf32> to vector<1xf32>
    %10 = vector.shape_cast %9 : vector<1xf32> to vector<1x1xf32>
    %cst_5 = arith.constant dense<0x7F800000> : vector<1xf32>
    %11 = vector.multi_reduction <minimumf>, %5, %cst_5 [1] : vector<1x256xf32> to vector<1xf32>
    %12 = vector.shape_cast %11 : vector<1xf32> to vector<1x1xf32>
    %cst_6 = arith.constant dense<0xFF800000> : vector<1xf32>
    %13 = vector.multi_reduction <maximumf>, %5, %cst_6 [1] : vector<1x256xf32> to vector<1xf32>
    %14 = vector.shape_cast %13 : vector<1xf32> to vector<1x1xf32>
    %cst_7 = arith.constant dense<0x7F800000> : vector<1xf32>
    %15 = vector.multi_reduction <minimumf>, %6, %cst_7 [1] : vector<1x256xf32> to vector<1xf32>
    %16 = vector.shape_cast %15 : vector<1xf32> to vector<1x1xf32>
    %cst_8 = arith.constant dense<0xFF800000> : vector<1xf32>
    %17 = vector.multi_reduction <maximumf>, %6, %cst_8 [1] : vector<1x256xf32> to vector<1xf32>
    %18 = vector.shape_cast %17 : vector<1xf32> to vector<1x1xf32>
    %c0_9 = arith.constant 0 : index
    %19 = memref.load %arg1[%c0_9] : memref<16xf32, #tpu.memory_space<smem>>
    %c1 = arith.constant 1 : index
    %20 = memref.load %arg1[%c1] : memref<16xf32, #tpu.memory_space<smem>>
    %c2 = arith.constant 2 : index
    %21 = memref.load %arg1[%c2] : memref<16xf32, #tpu.memory_space<smem>>
    %c3 = arith.constant 3 : index
    %22 = memref.load %arg1[%c3] : memref<16xf32, #tpu.memory_space<smem>>
    %c4 = arith.constant 4 : index
    %23 = memref.load %arg1[%c4] : memref<16xf32, #tpu.memory_space<smem>>
    %c5 = arith.constant 5 : index
    %24 = memref.load %arg1[%c5] : memref<16xf32, #tpu.memory_space<smem>>
    %c6 = arith.constant 6 : index
    %25 = memref.load %arg1[%c6] : memref<16xf32, #tpu.memory_space<smem>>
    %c7 = arith.constant 7 : index
    %26 = memref.load %arg1[%c7] : memref<16xf32, #tpu.memory_space<smem>>
    %c8 = arith.constant 8 : index
    %27 = memref.load %arg1[%c8] : memref<16xf32, #tpu.memory_space<smem>>
    %cst_10 = arith.constant 0.000000e+00 : f32
    %28 = arith.subf %cst_10, %20 : f32
    %cst_11 = arith.constant 0.000000e+00 : f32
    %29 = arith.subf %cst_11, %22 : f32
    %cst_12 = arith.constant 0.000000e+00 : f32
    %30 = arith.subf %cst_12, %24 : f32
    %cst_13 = arith.constant 1.000000e+00 : f32
    %31 = arith.mulf %21, %cst_13 : f32
    %cst_14 = arith.constant 0.000000e+00 : f32
    %32 = arith.addf %cst_14, %31 : f32
    %cst_15 = arith.constant 0.000000e+00 : f32
    %33 = arith.addf %32, %cst_15 : f32
    %cst_16 = arith.constant 0.000000e+00 : f32
    %34 = arith.mulf %22, %cst_16 : f32
    %35 = arith.addf %33, %34 : f32
    %cst_17 = arith.constant 0.000000e+00 : f32
    %36 = arith.mulf %21, %cst_17 : f32
    %cst_18 = arith.constant 0.000000e+00 : f32
    %37 = arith.addf %cst_18, %36 : f32
    %cst_19 = arith.constant 0.000000e+00 : f32
    %38 = arith.mulf %cst_19, %19 : f32
    %39 = arith.addf %37, %38 : f32
    %40 = arith.mulf %22, %20 : f32
    %41 = arith.addf %39, %40 : f32
    %cst_20 = arith.constant 0.000000e+00 : f32
    %42 = arith.mulf %21, %cst_20 : f32
    %cst_21 = arith.constant 0.000000e+00 : f32
    %43 = arith.addf %cst_21, %42 : f32
    %cst_22 = arith.constant 0.000000e+00 : f32
    %44 = arith.mulf %cst_22, %28 : f32
    %45 = arith.addf %43, %44 : f32
    %46 = arith.mulf %22, %19 : f32
    %47 = arith.addf %45, %46 : f32
    %cst_23 = arith.constant 1.000000e+00 : f32
    %48 = arith.mulf %cst_23, %19 : f32
    %cst_24 = arith.constant 0.000000e+00 : f32
    %49 = arith.addf %cst_24, %48 : f32
    %cst_25 = arith.constant 0.000000e+00 : f32
    %50 = arith.mulf %cst_25, %20 : f32
    %51 = arith.addf %49, %50 : f32
    %cst_26 = arith.constant 1.000000e+00 : f32
    %52 = arith.mulf %cst_26, %28 : f32
    %cst_27 = arith.constant 0.000000e+00 : f32
    %53 = arith.addf %cst_27, %52 : f32
    %cst_28 = arith.constant 0.000000e+00 : f32
    %54 = arith.mulf %cst_28, %19 : f32
    %55 = arith.addf %53, %54 : f32
    %cst_29 = arith.constant 1.000000e+00 : f32
    %56 = arith.mulf %29, %cst_29 : f32
    %cst_30 = arith.constant 0.000000e+00 : f32
    %57 = arith.addf %cst_30, %56 : f32
    %cst_31 = arith.constant 0.000000e+00 : f32
    %58 = arith.addf %57, %cst_31 : f32
    %cst_32 = arith.constant 0.000000e+00 : f32
    %59 = arith.mulf %21, %cst_32 : f32
    %60 = arith.addf %58, %59 : f32
    %cst_33 = arith.constant 0.000000e+00 : f32
    %61 = arith.mulf %29, %cst_33 : f32
    %cst_34 = arith.constant 0.000000e+00 : f32
    %62 = arith.addf %cst_34, %61 : f32
    %cst_35 = arith.constant 0.000000e+00 : f32
    %63 = arith.mulf %cst_35, %19 : f32
    %64 = arith.addf %62, %63 : f32
    %65 = arith.mulf %21, %20 : f32
    %66 = arith.addf %64, %65 : f32
    %cst_36 = arith.constant 0.000000e+00 : f32
    %67 = arith.mulf %29, %cst_36 : f32
    %cst_37 = arith.constant 0.000000e+00 : f32
    %68 = arith.addf %cst_37, %67 : f32
    %cst_38 = arith.constant 0.000000e+00 : f32
    %69 = arith.mulf %cst_38, %28 : f32
    %70 = arith.addf %68, %69 : f32
    %71 = arith.mulf %21, %19 : f32
    %72 = arith.addf %70, %71 : f32
    %73 = arith.mulf %23, %35 : f32
    %cst_39 = arith.constant 0.000000e+00 : f32
    %74 = arith.addf %cst_39, %73 : f32
    %cst_40 = arith.constant 0.000000e+00 : f32
    %75 = arith.mulf %30, %cst_40 : f32
    %76 = arith.addf %74, %75 : f32
    %cst_41 = arith.constant 0.000000e+00 : f32
    %77 = arith.mulf %cst_41, %60 : f32
    %78 = arith.addf %76, %77 : f32
    %79 = arith.mulf %23, %41 : f32
    %cst_42 = arith.constant 0.000000e+00 : f32
    %80 = arith.addf %cst_42, %79 : f32
    %81 = arith.mulf %30, %51 : f32
    %82 = arith.addf %80, %81 : f32
    %cst_43 = arith.constant 0.000000e+00 : f32
    %83 = arith.mulf %cst_43, %66 : f32
    %84 = arith.addf %82, %83 : f32
    %85 = arith.mulf %23, %47 : f32
    %cst_44 = arith.constant 0.000000e+00 : f32
    %86 = arith.addf %cst_44, %85 : f32
    %87 = arith.mulf %30, %55 : f32
    %88 = arith.addf %86, %87 : f32
    %cst_45 = arith.constant 0.000000e+00 : f32
    %89 = arith.mulf %cst_45, %72 : f32
    %90 = arith.addf %88, %89 : f32
    %91 = arith.mulf %24, %35 : f32
    %cst_46 = arith.constant 0.000000e+00 : f32
    %92 = arith.addf %cst_46, %91 : f32
    %cst_47 = arith.constant 0.000000e+00 : f32
    %93 = arith.mulf %23, %cst_47 : f32
    %94 = arith.addf %92, %93 : f32
    %cst_48 = arith.constant 0.000000e+00 : f32
    %95 = arith.mulf %cst_48, %60 : f32
    %96 = arith.addf %94, %95 : f32
    %97 = arith.mulf %24, %41 : f32
    %cst_49 = arith.constant 0.000000e+00 : f32
    %98 = arith.addf %cst_49, %97 : f32
    %99 = arith.mulf %23, %51 : f32
    %100 = arith.addf %98, %99 : f32
    %cst_50 = arith.constant 0.000000e+00 : f32
    %101 = arith.mulf %cst_50, %66 : f32
    %102 = arith.addf %100, %101 : f32
    %103 = arith.mulf %24, %47 : f32
    %cst_51 = arith.constant 0.000000e+00 : f32
    %104 = arith.addf %cst_51, %103 : f32
    %105 = arith.mulf %23, %55 : f32
    %106 = arith.addf %104, %105 : f32
    %cst_52 = arith.constant 0.000000e+00 : f32
    %107 = arith.mulf %cst_52, %72 : f32
    %108 = arith.addf %106, %107 : f32
    %cst_53 = arith.constant 0.000000e+00 : f32
    %109 = arith.mulf %cst_53, %35 : f32
    %cst_54 = arith.constant 0.000000e+00 : f32
    %110 = arith.addf %cst_54, %109 : f32
    %cst_55 = arith.constant 0.000000e+00 : f32
    %111 = arith.addf %110, %cst_55 : f32
    %cst_56 = arith.constant 1.000000e+00 : f32
    %112 = arith.mulf %cst_56, %60 : f32
    %113 = arith.addf %111, %112 : f32
    %cst_57 = arith.constant 0.000000e+00 : f32
    %114 = arith.mulf %cst_57, %41 : f32
    %cst_58 = arith.constant 0.000000e+00 : f32
    %115 = arith.addf %cst_58, %114 : f32
    %cst_59 = arith.constant 0.000000e+00 : f32
    %116 = arith.mulf %cst_59, %51 : f32
    %117 = arith.addf %115, %116 : f32
    %cst_60 = arith.constant 1.000000e+00 : f32
    %118 = arith.mulf %cst_60, %66 : f32
    %119 = arith.addf %117, %118 : f32
    %cst_61 = arith.constant 0.000000e+00 : f32
    %120 = arith.mulf %cst_61, %47 : f32
    %cst_62 = arith.constant 0.000000e+00 : f32
    %121 = arith.addf %cst_62, %120 : f32
    %cst_63 = arith.constant 0.000000e+00 : f32
    %122 = arith.mulf %cst_63, %55 : f32
    %123 = arith.addf %121, %122 : f32
    %cst_64 = arith.constant 1.000000e+00 : f32
    %124 = arith.mulf %cst_64, %72 : f32
    %125 = arith.addf %123, %124 : f32
    %cst_65 = arith.constant 2.000000e+00 : f32
    %126 = vector.broadcast %cst_65 : f32 to vector<1x1xf32>
    %127 = arith.mulf %126, %16 : vector<1x1xf32>
    %128 = arith.subf %10, %8 : vector<1x1xf32>
    %129 = arith.divf %127, %128 : vector<1x1xf32>
    %130 = arith.addf %10, %8 : vector<1x1xf32>
    %131 = arith.subf %10, %8 : vector<1x1xf32>
    %132 = arith.divf %130, %131 : vector<1x1xf32>
    %cst_66 = arith.constant 2.000000e+00 : f32
    %133 = vector.broadcast %cst_66 : f32 to vector<1x1xf32>
    %134 = arith.mulf %133, %16 : vector<1x1xf32>
    %135 = arith.subf %14, %12 : vector<1x1xf32>
    %136 = arith.divf %134, %135 : vector<1x1xf32>
    %137 = arith.addf %14, %12 : vector<1x1xf32>
    %138 = arith.subf %14, %12 : vector<1x1xf32>
    %139 = arith.divf %137, %138 : vector<1x1xf32>
    %140 = arith.addf %18, %16 : vector<1x1xf32>
    %141 = arith.subf %18, %16 : vector<1x1xf32>
    %142 = arith.divf %140, %141 : vector<1x1xf32>
    %cst_67 = arith.constant 0.000000e+00 : f32
    %143 = vector.broadcast %cst_67 : f32 to vector<1x1xf32>
    %144 = arith.subf %143, %142 : vector<1x1xf32>
    %cst_68 = arith.constant 2.000000e+00 : f32
    %145 = vector.broadcast %cst_68 : f32 to vector<1x1xf32>
    %146 = arith.mulf %145, %18 : vector<1x1xf32>
    %147 = arith.mulf %146, %16 : vector<1x1xf32>
    %148 = arith.subf %18, %16 : vector<1x1xf32>
    %149 = arith.divf %147, %148 : vector<1x1xf32>
    %cst_69 = arith.constant 0.000000e+00 : f32
    %150 = vector.broadcast %cst_69 : f32 to vector<1x1xf32>
    %151 = arith.subf %150, %149 : vector<1x1xf32>
    %152 = arith.subf %10, %8 : vector<1x1xf32>
    %cst_70 = arith.constant 5.000000e-01 : f32
    %153 = vector.broadcast %cst_70 : f32 to vector<1x1xf32>
    %154 = arith.mulf %152, %153 : vector<1x1xf32>
    %155 = arith.addf %10, %8 : vector<1x1xf32>
    %cst_71 = arith.constant 5.000000e-01 : f32
    %156 = vector.broadcast %cst_71 : f32 to vector<1x1xf32>
    %157 = arith.mulf %155, %156 : vector<1x1xf32>
    %158 = arith.subf %14, %12 : vector<1x1xf32>
    %cst_72 = arith.constant 5.000000e-01 : f32
    %159 = vector.broadcast %cst_72 : f32 to vector<1x1xf32>
    %160 = arith.mulf %158, %159 : vector<1x1xf32>
    %161 = arith.addf %14, %12 : vector<1x1xf32>
    %cst_73 = arith.constant 5.000000e-01 : f32
    %162 = vector.broadcast %cst_73 : f32 to vector<1x1xf32>
    %163 = arith.mulf %161, %162 : vector<1x1xf32>
    %164 = arith.mulf %154, %129 : vector<1x1xf32>
    %cst_74 = arith.constant 0.000000e+00 : f32
    %165 = vector.broadcast %cst_74 : f32 to vector<1x1xf32>
    %166 = arith.addf %165, %164 : vector<1x1xf32>
    %cst_75 = arith.constant 0.000000e+00 : f32
    %167 = vector.broadcast %cst_75 : f32 to vector<1x1xf32>
    %168 = arith.addf %166, %167 : vector<1x1xf32>
    %cst_76 = arith.constant 0.000000e+00 : f32
    %169 = vector.broadcast %cst_76 : f32 to vector<1x1xf32>
    %170 = arith.addf %168, %169 : vector<1x1xf32>
    %cst_77 = arith.constant 0.000000e+00 : f32
    %171 = vector.broadcast %cst_77 : f32 to vector<1x1xf32>
    %172 = arith.mulf %157, %171 : vector<1x1xf32>
    %173 = arith.addf %170, %172 : vector<1x1xf32>
    %cst_78 = arith.constant 0.000000e+00 : f32
    %174 = vector.broadcast %cst_78 : f32 to vector<1x1xf32>
    %175 = arith.mulf %154, %174 : vector<1x1xf32>
    %cst_79 = arith.constant 0.000000e+00 : f32
    %176 = vector.broadcast %cst_79 : f32 to vector<1x1xf32>
    %177 = arith.addf %176, %175 : vector<1x1xf32>
    %cst_80 = arith.constant 0.000000e+00 : f32
    %178 = vector.broadcast %cst_80 : f32 to vector<1x1xf32>
    %179 = arith.mulf %178, %136 : vector<1x1xf32>
    %180 = arith.addf %177, %179 : vector<1x1xf32>
    %cst_81 = arith.constant 0.000000e+00 : f32
    %181 = vector.broadcast %cst_81 : f32 to vector<1x1xf32>
    %182 = arith.addf %180, %181 : vector<1x1xf32>
    %cst_82 = arith.constant 0.000000e+00 : f32
    %183 = vector.broadcast %cst_82 : f32 to vector<1x1xf32>
    %184 = arith.mulf %157, %183 : vector<1x1xf32>
    %185 = arith.addf %182, %184 : vector<1x1xf32>
    %186 = arith.mulf %154, %132 : vector<1x1xf32>
    %cst_83 = arith.constant 0.000000e+00 : f32
    %187 = vector.broadcast %cst_83 : f32 to vector<1x1xf32>
    %188 = arith.addf %187, %186 : vector<1x1xf32>
    %cst_84 = arith.constant 0.000000e+00 : f32
    %189 = vector.broadcast %cst_84 : f32 to vector<1x1xf32>
    %190 = arith.mulf %189, %139 : vector<1x1xf32>
    %191 = arith.addf %188, %190 : vector<1x1xf32>
    %cst_85 = arith.constant 0.000000e+00 : f32
    %192 = vector.broadcast %cst_85 : f32 to vector<1x1xf32>
    %193 = arith.mulf %192, %144 : vector<1x1xf32>
    %194 = arith.addf %191, %193 : vector<1x1xf32>
    %cst_86 = arith.constant -1.000000e+00 : f32
    %195 = vector.broadcast %cst_86 : f32 to vector<1x1xf32>
    %196 = arith.mulf %157, %195 : vector<1x1xf32>
    %197 = arith.addf %194, %196 : vector<1x1xf32>
    %cst_87 = arith.constant 0.000000e+00 : f32
    %198 = vector.broadcast %cst_87 : f32 to vector<1x1xf32>
    %199 = arith.mulf %154, %198 : vector<1x1xf32>
    %cst_88 = arith.constant 0.000000e+00 : f32
    %200 = vector.broadcast %cst_88 : f32 to vector<1x1xf32>
    %201 = arith.addf %200, %199 : vector<1x1xf32>
    %cst_89 = arith.constant 0.000000e+00 : f32
    %202 = vector.broadcast %cst_89 : f32 to vector<1x1xf32>
    %203 = arith.addf %201, %202 : vector<1x1xf32>
    %cst_90 = arith.constant 0.000000e+00 : f32
    %204 = vector.broadcast %cst_90 : f32 to vector<1x1xf32>
    %205 = arith.mulf %204, %151 : vector<1x1xf32>
    %206 = arith.addf %203, %205 : vector<1x1xf32>
    %cst_91 = arith.constant 0.000000e+00 : f32
    %207 = vector.broadcast %cst_91 : f32 to vector<1x1xf32>
    %208 = arith.mulf %157, %207 : vector<1x1xf32>
    %209 = arith.addf %206, %208 : vector<1x1xf32>
    %cst_92 = arith.constant 0.000000e+00 : f32
    %210 = vector.broadcast %cst_92 : f32 to vector<1x1xf32>
    %211 = arith.mulf %210, %129 : vector<1x1xf32>
    %cst_93 = arith.constant 0.000000e+00 : f32
    %212 = vector.broadcast %cst_93 : f32 to vector<1x1xf32>
    %213 = arith.addf %212, %211 : vector<1x1xf32>
    %cst_94 = arith.constant 0.000000e+00 : f32
    %214 = vector.broadcast %cst_94 : f32 to vector<1x1xf32>
    %215 = arith.mulf %160, %214 : vector<1x1xf32>
    %216 = arith.addf %213, %215 : vector<1x1xf32>
    %cst_95 = arith.constant 0.000000e+00 : f32
    %217 = vector.broadcast %cst_95 : f32 to vector<1x1xf32>
    %218 = arith.addf %216, %217 : vector<1x1xf32>
    %cst_96 = arith.constant 0.000000e+00 : f32
    %219 = vector.broadcast %cst_96 : f32 to vector<1x1xf32>
    %220 = arith.mulf %163, %219 : vector<1x1xf32>
    %221 = arith.addf %218, %220 : vector<1x1xf32>
    %222 = arith.mulf %160, %136 : vector<1x1xf32>
    %cst_97 = arith.constant 0.000000e+00 : f32
    %223 = vector.broadcast %cst_97 : f32 to vector<1x1xf32>
    %224 = arith.addf %223, %222 : vector<1x1xf32>
    %cst_98 = arith.constant 0.000000e+00 : f32
    %225 = vector.broadcast %cst_98 : f32 to vector<1x1xf32>
    %226 = arith.addf %224, %225 : vector<1x1xf32>
    %cst_99 = arith.constant 0.000000e+00 : f32
    %227 = vector.broadcast %cst_99 : f32 to vector<1x1xf32>
    %228 = arith.mulf %163, %227 : vector<1x1xf32>
    %229 = arith.addf %226, %228 : vector<1x1xf32>
    %cst_100 = arith.constant 0.000000e+00 : f32
    %230 = vector.broadcast %cst_100 : f32 to vector<1x1xf32>
    %231 = arith.mulf %230, %132 : vector<1x1xf32>
    %cst_101 = arith.constant 0.000000e+00 : f32
    %232 = vector.broadcast %cst_101 : f32 to vector<1x1xf32>
    %233 = arith.addf %232, %231 : vector<1x1xf32>
    %234 = arith.mulf %160, %139 : vector<1x1xf32>
    %235 = arith.addf %233, %234 : vector<1x1xf32>
    %cst_102 = arith.constant 0.000000e+00 : f32
    %236 = vector.broadcast %cst_102 : f32 to vector<1x1xf32>
    %237 = arith.mulf %236, %144 : vector<1x1xf32>
    %238 = arith.addf %235, %237 : vector<1x1xf32>
    %cst_103 = arith.constant -1.000000e+00 : f32
    %239 = vector.broadcast %cst_103 : f32 to vector<1x1xf32>
    %240 = arith.mulf %163, %239 : vector<1x1xf32>
    %241 = arith.addf %238, %240 : vector<1x1xf32>
    %cst_104 = arith.constant 0.000000e+00 : f32
    %242 = vector.broadcast %cst_104 : f32 to vector<1x1xf32>
    %243 = arith.mulf %160, %242 : vector<1x1xf32>
    %cst_105 = arith.constant 0.000000e+00 : f32
    %244 = vector.broadcast %cst_105 : f32 to vector<1x1xf32>
    %245 = arith.addf %244, %243 : vector<1x1xf32>
    %cst_106 = arith.constant 0.000000e+00 : f32
    %246 = vector.broadcast %cst_106 : f32 to vector<1x1xf32>
    %247 = arith.mulf %246, %151 : vector<1x1xf32>
    %248 = arith.addf %245, %247 : vector<1x1xf32>
    %cst_107 = arith.constant 0.000000e+00 : f32
    %249 = vector.broadcast %cst_107 : f32 to vector<1x1xf32>
    %250 = arith.mulf %163, %249 : vector<1x1xf32>
    %251 = arith.addf %248, %250 : vector<1x1xf32>
    %252 = vector.broadcast %78 : f32 to vector<1x1xf32>
    %253 = arith.mulf %173, %252 : vector<1x1xf32>
    %cst_108 = arith.constant 0.000000e+00 : f32
    %254 = vector.broadcast %cst_108 : f32 to vector<1x1xf32>
    %255 = arith.addf %254, %253 : vector<1x1xf32>
    %256 = vector.broadcast %96 : f32 to vector<1x1xf32>
    %257 = arith.mulf %185, %256 : vector<1x1xf32>
    %258 = arith.addf %255, %257 : vector<1x1xf32>
    %259 = vector.broadcast %113 : f32 to vector<1x1xf32>
    %260 = arith.mulf %197, %259 : vector<1x1xf32>
    %261 = arith.addf %258, %260 : vector<1x1xf32>
    %cst_109 = arith.constant 0.000000e+00 : f32
    %262 = vector.broadcast %cst_109 : f32 to vector<1x1xf32>
    %263 = arith.mulf %209, %262 : vector<1x1xf32>
    %264 = arith.addf %261, %263 : vector<1x1xf32>
    %265 = vector.broadcast %84 : f32 to vector<1x1xf32>
    %266 = arith.mulf %173, %265 : vector<1x1xf32>
    %cst_110 = arith.constant 0.000000e+00 : f32
    %267 = vector.broadcast %cst_110 : f32 to vector<1x1xf32>
    %268 = arith.addf %267, %266 : vector<1x1xf32>
    %269 = vector.broadcast %102 : f32 to vector<1x1xf32>
    %270 = arith.mulf %185, %269 : vector<1x1xf32>
    %271 = arith.addf %268, %270 : vector<1x1xf32>
    %272 = vector.broadcast %119 : f32 to vector<1x1xf32>
    %273 = arith.mulf %197, %272 : vector<1x1xf32>
    %274 = arith.addf %271, %273 : vector<1x1xf32>
    %cst_111 = arith.constant 0.000000e+00 : f32
    %275 = vector.broadcast %cst_111 : f32 to vector<1x1xf32>
    %276 = arith.mulf %209, %275 : vector<1x1xf32>
    %277 = arith.addf %274, %276 : vector<1x1xf32>
    %278 = vector.broadcast %90 : f32 to vector<1x1xf32>
    %279 = arith.mulf %173, %278 : vector<1x1xf32>
    %cst_112 = arith.constant 0.000000e+00 : f32
    %280 = vector.broadcast %cst_112 : f32 to vector<1x1xf32>
    %281 = arith.addf %280, %279 : vector<1x1xf32>
    %282 = vector.broadcast %108 : f32 to vector<1x1xf32>
    %283 = arith.mulf %185, %282 : vector<1x1xf32>
    %284 = arith.addf %281, %283 : vector<1x1xf32>
    %285 = vector.broadcast %125 : f32 to vector<1x1xf32>
    %286 = arith.mulf %197, %285 : vector<1x1xf32>
    %287 = arith.addf %284, %286 : vector<1x1xf32>
    %cst_113 = arith.constant 0.000000e+00 : f32
    %288 = vector.broadcast %cst_113 : f32 to vector<1x1xf32>
    %289 = arith.mulf %209, %288 : vector<1x1xf32>
    %290 = arith.addf %287, %289 : vector<1x1xf32>
    %291 = vector.broadcast %25 : f32 to vector<1x1xf32>
    %292 = arith.mulf %173, %291 : vector<1x1xf32>
    %cst_114 = arith.constant 0.000000e+00 : f32
    %293 = vector.broadcast %cst_114 : f32 to vector<1x1xf32>
    %294 = arith.addf %293, %292 : vector<1x1xf32>
    %295 = vector.broadcast %26 : f32 to vector<1x1xf32>
    %296 = arith.mulf %185, %295 : vector<1x1xf32>
    %297 = arith.addf %294, %296 : vector<1x1xf32>
    %298 = vector.broadcast %27 : f32 to vector<1x1xf32>
    %299 = arith.mulf %197, %298 : vector<1x1xf32>
    %300 = arith.addf %297, %299 : vector<1x1xf32>
    %cst_115 = arith.constant 1.000000e+00 : f32
    %301 = vector.broadcast %cst_115 : f32 to vector<1x1xf32>
    %302 = arith.mulf %209, %301 : vector<1x1xf32>
    %303 = arith.addf %300, %302 : vector<1x1xf32>
    %304 = vector.broadcast %78 : f32 to vector<1x1xf32>
    %305 = arith.mulf %221, %304 : vector<1x1xf32>
    %cst_116 = arith.constant 0.000000e+00 : f32
    %306 = vector.broadcast %cst_116 : f32 to vector<1x1xf32>
    %307 = arith.addf %306, %305 : vector<1x1xf32>
    %308 = vector.broadcast %96 : f32 to vector<1x1xf32>
    %309 = arith.mulf %229, %308 : vector<1x1xf32>
    %310 = arith.addf %307, %309 : vector<1x1xf32>
    %311 = vector.broadcast %113 : f32 to vector<1x1xf32>
    %312 = arith.mulf %241, %311 : vector<1x1xf32>
    %313 = arith.addf %310, %312 : vector<1x1xf32>
    %cst_117 = arith.constant 0.000000e+00 : f32
    %314 = vector.broadcast %cst_117 : f32 to vector<1x1xf32>
    %315 = arith.mulf %251, %314 : vector<1x1xf32>
    %316 = arith.addf %313, %315 : vector<1x1xf32>
    %317 = vector.broadcast %84 : f32 to vector<1x1xf32>
    %318 = arith.mulf %221, %317 : vector<1x1xf32>
    %cst_118 = arith.constant 0.000000e+00 : f32
    %319 = vector.broadcast %cst_118 : f32 to vector<1x1xf32>
    %320 = arith.addf %319, %318 : vector<1x1xf32>
    %321 = vector.broadcast %102 : f32 to vector<1x1xf32>
    %322 = arith.mulf %229, %321 : vector<1x1xf32>
    %323 = arith.addf %320, %322 : vector<1x1xf32>
    %324 = vector.broadcast %119 : f32 to vector<1x1xf32>
    %325 = arith.mulf %241, %324 : vector<1x1xf32>
    %326 = arith.addf %323, %325 : vector<1x1xf32>
    %cst_119 = arith.constant 0.000000e+00 : f32
    %327 = vector.broadcast %cst_119 : f32 to vector<1x1xf32>
    %328 = arith.mulf %251, %327 : vector<1x1xf32>
    %329 = arith.addf %326, %328 : vector<1x1xf32>
    %330 = vector.broadcast %90 : f32 to vector<1x1xf32>
    %331 = arith.mulf %221, %330 : vector<1x1xf32>
    %cst_120 = arith.constant 0.000000e+00 : f32
    %332 = vector.broadcast %cst_120 : f32 to vector<1x1xf32>
    %333 = arith.addf %332, %331 : vector<1x1xf32>
    %334 = vector.broadcast %108 : f32 to vector<1x1xf32>
    %335 = arith.mulf %229, %334 : vector<1x1xf32>
    %336 = arith.addf %333, %335 : vector<1x1xf32>
    %337 = vector.broadcast %125 : f32 to vector<1x1xf32>
    %338 = arith.mulf %241, %337 : vector<1x1xf32>
    %339 = arith.addf %336, %338 : vector<1x1xf32>
    %cst_121 = arith.constant 0.000000e+00 : f32
    %340 = vector.broadcast %cst_121 : f32 to vector<1x1xf32>
    %341 = arith.mulf %251, %340 : vector<1x1xf32>
    %342 = arith.addf %339, %341 : vector<1x1xf32>
    %343 = vector.broadcast %25 : f32 to vector<1x1xf32>
    %344 = arith.mulf %221, %343 : vector<1x1xf32>
    %cst_122 = arith.constant 0.000000e+00 : f32
    %345 = vector.broadcast %cst_122 : f32 to vector<1x1xf32>
    %346 = arith.addf %345, %344 : vector<1x1xf32>
    %347 = vector.broadcast %26 : f32 to vector<1x1xf32>
    %348 = arith.mulf %229, %347 : vector<1x1xf32>
    %349 = arith.addf %346, %348 : vector<1x1xf32>
    %350 = vector.broadcast %27 : f32 to vector<1x1xf32>
    %351 = arith.mulf %241, %350 : vector<1x1xf32>
    %352 = arith.addf %349, %351 : vector<1x1xf32>
    %cst_123 = arith.constant 1.000000e+00 : f32
    %353 = vector.broadcast %cst_123 : f32 to vector<1x1xf32>
    %354 = arith.mulf %251, %353 : vector<1x1xf32>
    %355 = arith.addf %352, %354 : vector<1x1xf32>
    %356 = vector.extract_strided_slice %3 {offsets = [0, 768], sizes = [1, 128], strides = [1, 1]} : vector<1x1152xf32> to vector<1x128xf32>
    %357 = vector.extract_strided_slice %3 {offsets = [0, 896], sizes = [1, 128], strides = [1, 1]} : vector<1x1152xf32> to vector<1x128xf32>
    %358 = vector.extract_strided_slice %3 {offsets = [0, 1024], sizes = [1, 128], strides = [1, 1]} : vector<1x1152xf32> to vector<1x128xf32>
    %359 = vector.broadcast %264 : vector<1x1xf32> to vector<1x128xf32>
    %360 = arith.mulf %359, %356 : vector<1x128xf32>
    %361 = vector.broadcast %277 : vector<1x1xf32> to vector<1x128xf32>
    %362 = arith.mulf %361, %357 : vector<1x128xf32>
    %363 = arith.addf %360, %362 : vector<1x128xf32>
    %364 = vector.broadcast %290 : vector<1x1xf32> to vector<1x128xf32>
    %365 = arith.mulf %364, %358 : vector<1x128xf32>
    %366 = arith.addf %363, %365 : vector<1x128xf32>
    %367 = vector.broadcast %303 : vector<1x1xf32> to vector<1x128xf32>
    %368 = arith.addf %366, %367 : vector<1x128xf32>
    %c0_124 = arith.constant 0 : index
    %c0_125 = arith.constant 0 : index
    %369 = vector.load %arg4[%c0_124, %c0_125] : memref<2x128xf32, #tpu.memory_space<vmem>>, vector<1x128xf32>
    tpu.vector_store %arg4[%c0_124, %c0_125], %368 {strides = array<i32>} : memref<2x128xf32, #tpu.memory_space<vmem>>, vector<1x128xf32>,
    %370 = vector.broadcast %316 : vector<1x1xf32> to vector<1x128xf32>
    %371 = arith.mulf %370, %356 : vector<1x128xf32>
    %372 = vector.broadcast %329 : vector<1x1xf32> to vector<1x128xf32>
    %373 = arith.mulf %372, %357 : vector<1x128xf32>
    %374 = arith.addf %371, %373 : vector<1x128xf32>
    %375 = vector.broadcast %342 : vector<1x1xf32> to vector<1x128xf32>
    %376 = arith.mulf %375, %358 : vector<1x128xf32>
    %377 = arith.addf %374, %376 : vector<1x128xf32>
    %378 = vector.broadcast %355 : vector<1x1xf32> to vector<1x128xf32>
    %379 = arith.addf %377, %378 : vector<1x128xf32>
    %c1_126 = arith.constant 1 : index
    %c0_127 = arith.constant 0 : index
    %380 = vector.load %arg4[%c1_126, %c0_127] : memref<2x128xf32, #tpu.memory_space<vmem>>, vector<1x128xf32>
    tpu.vector_store %arg4[%c1_126, %c0_127], %379 {strides = array<i32>} : memref<2x128xf32, #tpu.memory_space<vmem>>, vector<1x128xf32>,
    return
  }
  func.func @transform_0(%arg0: i32) -> i32 {
    %c0_i32 = arith.constant 0 : i32
    %c0_i32_0 = arith.constant 0 : i32
    return %c0_i32 : i32
  }
  func.func @transform_1(%arg0: i32) -> (i32, i32) {
    %c0_i32 = arith.constant 0 : i32
    %c0_i32_0 = arith.constant 0 : i32
    %c0_i32_1 = arith.constant 0 : i32
    return %c0_i32, %c0_i32_0 : i32, i32
  }
  func.func @transform_2(%arg0: i32) -> (i32, i32) {
    %c0_i32 = arith.constant 0 : i32
    %c0_i32_0 = arith.constant 0 : i32
    %c0_i32_1 = arith.constant 0 : i32
    return %c0_i32, %c0_i32_0 : i32, i32
  }
  func.func @transform_3(%arg0: i32) -> (i32, i32) {
    %c0_i32 = arith.constant 0 : i32
    %c0_i32_0 = arith.constant 0 : i32
    %c0_i32_1 = arith.constant 0 : i32
    return %c0_i32, %c0_i32_0 : i32, i32
  }
}

</mosaic_0001>

<bundles_post_ra>
// kernel: net_forward.1
= control target key start
LH: loop header
LB: loop body
LE: loop exit
PB: predicated region body
PF: predicated region fallthrough
CT: control target
= control target key end

     0   :  { %8 = vsyncpa [#allocation4], 0  ;;  %s1266_s0 = inlined_call_operand.vmem [shape: f32[16], index: 0, kind: input, shape index: {}]   ;;  %s1267_s1 = inlined_call_operand.vmem [shape: f32[1,56], index: 1, kind: input, shape index: {}]   ;;  %s1268_s2 = inlined_call_operand.hbm [shape: bf16[56,1152], index: 2, kind: input, shape index: {}]   ;;  %s1269_s3 = inlined_call_operand.vmem [shape: f32[2,128], index: 3, kind: output, shape index: {}]  }
   0x1   :  { %s15_s14 = sshll.u32 %s1266_s0, 4  ;;  %s16_s14 = int_to_ptr.vmem [resolvable:$true] %s15_s14 }
   0x2   :  { %9 = vsyncpa [#allocation3], 0  ;;  %s25_s17 = sshll.u32 %s1268_s2, 4  ;;  %s911_s18 = smov [#allocation2]   ;;  %s26_s17 = int_to_ptr.hbm [resolvable:$true] %s25_s17 }
   0x3   :  { %18 = dma.vmem_to_smem %s16_s14, 16, %s911_s18, [#allocation4]  }
   0x4   :  { %s912_s19 = smov [#allocation5]   ;;  %s913_s21 = smov 576  }
   0x5   :  { %s27_s20 = sshll.u32 %s912_s19, 4  ;;  %s914_s22 = smov 36   ;;  %s28_s20 = int_to_ptr.vmem [resolvable:$true] %s27_s20 }
   0x6   :  { %33 = dma.hbm_to_vmem [thread:$0]  %s26_s17, 4032, %s28_s20, [#allocation3], %s913_s21, %s913_s21, %s914_s22  }
   0x7   :  { %907 = dma.done.wait [#allocation4], 16  }
   0x8   :  { %908 = vsyncadd [#allocation4], 4294967280 }
   0x9   :  { %909 = dma.done.wait [#allocation3], 4032  }
   0xa   :  { %910 = vsyncadd [#allocation3], 4294963264 }
   0xb   :  { %42 = sfence }
   0xc   :  { %v76_v0 = vld [vmem:[#allocation5 + $0xd8] sm:$0xff]  ;;  %v77_v1 = vld [vmem:[#allocation5 + $0xe0] sm:$0xff]  ;;  %vm246_vm0 = vcmask 1043456   ;;  %v783_v6 = vld [vmem:[#allocation5 + $0x90] sm:$0xf]  ;;  %vm242_vm1 = vcmask 457728  }
   0xd   :  { %v170_v2 = vunpack.c.l.b16 %v76_v0  ;;  %v171_v3 = vunpack.c.h.b16 %v76_v0  ;;  %v172_v4 = vunpack.c.l.b16 %v77_v1  ;;  %v173_v5 = vunpack.c.h.b16 %v77_v1  ;;  %v856_v7 = vld [vmem:[#allocation5 + $0xb0] sm:$0xf0]  ;;  %v785_v13 = vld [vmem:[#allocation5 + $0xb4] sm:$0xf0]  ;;  %v857_v15 = vld [vmem:[#allocation5 + $0xb8] sm:$0xf0] }
   0xe   :  { %v852_v12 = vld [vmem:[#allocation5 + $0x94] sm:$0xf]  ;;  %v791_v14 = vld [vmem:[#allocation5 + $0x98] sm:$0xf]  ;;  %v853_v16 = vld [vmem:[#allocation5 + $0x9c] sm:$0xf]  ;;  %v784_v22 = vor.u32 %v856_v7, %v783_v6 }
   0xf   :  { %v206_v8 = vpack.c.b16 %v170_v2, %v170_v2  ;;  %v207_v9 = vpack.c.b16 %v171_v3, %v171_v3  ;;  %v208_v10 = vpack.c.b16 %v172_v4, %v172_v4  ;;  %v209_v11 = vpack.c.b16 %v173_v5, %v173_v5  ;;  %v793_v17 = vld [vmem:[#allocation5 + $0xbc] sm:$0xf0]  ;;  %v747_v24 = vld [vmem:[#allocation5 + $0x48] sm:$0xf]  ;;  %v847_v25 = vld [vmem:[#allocation5 + $0x68] sm:$0xf0] }
  0x10   :  { %v788_v23 = vor.u32 %v852_v12, %v785_v13  ;;  %v792_v26 = vor.u32 %v857_v15, %v791_v14  ;;  %v796_v27 = vor.u32 %v853_v16, %v793_v17  ;;  %v843_v28 = vld [vmem:[#allocation5 + $0x4c] sm:$0xf]  ;;  %v749_v29 = vld [vmem:[#allocation5 + $0x6c] sm:$0xf0]  ;;  %v848_v31 = vld [vmem:[#allocation5 + $0x70] sm:$0xf0]  ;;  %v748_v35 = vor.u32 %v847_v25, %v747_v24 }
  0x11   :  { %v248_v18 = vsel %vm246_vm0, %v206_v8, 0  ;;  %v251_v19 = vsel %vm246_vm0, %v207_v9, 0  ;;  %v254_v20 = vsel %vm246_vm0, %v208_v10, 0  ;;  %v257_v21 = vsel %vm246_vm0, %v209_v11, 0  ;;  %v755_v30 = vld [vmem:[#allocation5 + $0x50] sm:$0xf] }
  0x12   :  { %278 = vmatpush.bf16.msra.mxu0 %v248_v18  ;;  %291 = vmatpush.bf16.msra.mxu1 %v251_v19  ;;  %v844_v32 = vld [vmem:[#allocation5 + $0x54] sm:$0xf]  ;;  %v757_v33 = vld [vmem:[#allocation5 + $0x74] sm:$0xf0]  ;;  %v78_v34 = vld [vmem:[#allocation5 + $0xe8] sm:$0xff]  ;;  %v752_v36 = vor.u32 %v843_v28, %v749_v29  ;;  %v756_v41 = vor.u32 %v848_v31, %v755_v30  ;;  %vm391_vm2 = vcmask 1040384  }
  0x13   :  { %304 = vmatpush.bf16.msra.mxu2 %v254_v20  ;;  %317 = vmatpush.bf16.msra.mxu3 %v257_v21  ;;  %v711_v37 = vld [vmem:[#allocation5] sm:$0xf]  ;;  %v838_v38 = vld [vmem:[#allocation5 + $0x20] sm:$0xf0]  ;;  %v174_v39 = vunpack.c.l.b16 %v78_v34  ;;  %v175_v40 = vunpack.c.h.b16 %v78_v34  ;;  %v760_v42 = vor.u32 %v844_v32, %v757_v33  ;;  %v713_v44 = vld [vmem:[#allocation5 + $0x24] sm:$0xf0] }
  0x14   :  { %v834_v43 = vld [vmem:[#allocation5 + $0x4] sm:$0xf]  ;;  %v719_v45 = vld [vmem:[#allocation5 + $0x8] sm:$0xf]  ;;  %v839_v46 = vld [vmem:[#allocation5 + $0x28] sm:$0xf0]  ;;  %v712_v51 = vor.u32 %v838_v38, %v711_v37 }
  0x15   :  { %v835_v47 = vld [vmem:[#allocation5 + $0xc] sm:$0xf]  ;;  %v721_v48 = vld [vmem:[#allocation5 + $0x2c] sm:$0xf0]  ;;  %v210_v49 = vpack.c.b16 %v174_v39, %v174_v39  ;;  %v211_v50 = vpack.c.b16 %v175_v40, %v175_v40  ;;  %v716_v52 = vor.u32 %v834_v43, %v713_v44  ;;  %v44_v53 = vld [vmem:[%s1267_s1] sm:$0x1]  ;;  %v720_v54 = vor.u32 %v839_v46, %v719_v45 }
  0x16   :  { %279 = vmatpush.bf16.msra.mxu0 %v784_v22  ;;  %292 = vmatpush.bf16.msra.mxu1 %v788_v23  ;;  %v724_v55 = vor.u32 %v835_v47, %v721_v48  ;;  %v799_v56 = vld [vmem:[#allocation5 + $0xa0] sm:$0xf]  ;;  %v858_v57 = vld [vmem:[#allocation5 + $0xc0] sm:$0xf0]  ;;  %v948_v58 = vpack.c.bf16 %v44_v53, %v44_v53  ;;  %v801_v62 = vld [vmem:[#allocation5 + $0xc4] sm:$0xf0] }
  0x17   :  { %305 = vmatpush.bf16.msra.mxu2 %v792_v26  ;;  %318 = vmatpush.bf16.msra.mxu3 %v796_v27  ;;  %v260_v59 = vsel %vm246_vm0, %v210_v49, 0  ;;  %v263_v60 = vsel %vm246_vm0, %v211_v50, 0  ;;  %v854_v61 = vld [vmem:[#allocation5 + $0xa4] sm:$0xf]  ;;  %v800_v63 = vor.u32 %v858_v57, %v799_v56  ;;  %v763_v1 = vld [vmem:[#allocation5 + $0x58] sm:$0xf] }
  0x18   :  { %v804_v0 = vor.u32 %v854_v61, %v801_v62  ;;  %v849_v2 = vld [vmem:[#allocation5 + $0x78] sm:$0xf0]  ;;  %v765_v4 = vld [vmem:[#allocation5 + $0x7c] sm:$0xf0]  ;;  %v727_v7 = vld [vmem:[#allocation5 + $0x10] sm:$0xf] }
  0x19   :  { %v845_v3 = vld [vmem:[#allocation5 + $0x5c] sm:$0xf]  ;;  %v764_v5 = vor.u32 %v849_v2, %v763_v1  ;;  %v840_v8 = vld [vmem:[#allocation5 + $0x30] sm:$0xf0]  ;;  %v729_v10 = vld [vmem:[#allocation5 + $0x34] sm:$0xf0] }
  0x1a   :  { %280 = vmatpush.bf16.msra.mxu0 %v748_v35  ;;  %293 = vmatpush.bf16.msra.mxu1 %v752_v36  ;;  %v768_v6 = vor.u32 %v845_v3, %v765_v4  ;;  %v836_v9 = vld [vmem:[#allocation5 + $0x14] sm:$0xf]  ;;  %v728_v11 = vor.u32 %v840_v8, %v727_v7  ;;  %v807_v20 = vld [vmem:[#allocation5 + $0xa8] sm:$0xf]  ;;  %v859_v21 = vld [vmem:[#allocation5 + $0xc8] sm:$0xf0] }
  0x1b   :  { %306 = vmatpush.bf16.msra.mxu2 %v756_v41  ;;  %319 = vmatpush.bf16.msra.mxu3 %v760_v42  ;;  %v732_v12 = vor.u32 %v836_v9, %v729_v10  ;;  %v79_v13 = vld [vmem:[#allocation5 + $0xf0] sm:$0xff]  ;;  %v808_v22 = vor.u32 %v859_v21, %v807_v20  ;;  %v855_v23 = vld [vmem:[#allocation5 + $0xac] sm:$0xf]  ;;  %v80_v26 = vld [vmem:[#allocation5 + $0xf8] sm:$0xf]  ;;  %s985_s1 = sld [smem:[#allocation2 + $0x1]] }
  0x1c   :  { %v176_v14 = vunpack.c.l.b16 %v79_v13  ;;  %v177_v15 = vunpack.c.h.b16 %v79_v13  ;;  %v809_v24 = vld [vmem:[#allocation5 + $0xcc] sm:$0xf0]  ;;  %v178_v27 = vunpack.c.l.b16 %v80_v26  ;;  %v771_v28 = vld [vmem:[#allocation5 + $0x60] sm:$0xf]  ;;  %v850_v29 = vld [vmem:[#allocation5 + $0x80] sm:$0xf0] }
  0x1d   :  { %v812_v25 = vor.u32 %v855_v23, %v809_v24  ;;  %v846_v30 = vld [vmem:[#allocation5 + $0x64] sm:$0xf]  ;;  %v772_v32 = vor.u32 %v850_v29, %v771_v28  ;;  %v773_v33 = vld [vmem:[#allocation5 + $0x84] sm:$0xf0]  ;;  %v815_v34 = vld [vmem:[#allocation5 + $0xb0] sm:$0xf] }
  0x1e   :  { %281 = vmatpush.bf16.msra.mxu0 %v712_v51  ;;  %294 = vmatpush.bf16.msra.mxu1 %v716_v52  ;;  %v212_v16 = vpack.c.b16 %v176_v14, %v176_v14  ;;  %v213_v17 = vpack.c.b16 %v177_v15, %v177_v15  ;;  %v214_v31 = vpack.c.b16 %v178_v27, %v178_v27  ;;  %v860_v35 = vld [vmem:[#allocation5 + $0xd0] sm:$0xf0]  ;;  %v735_v37 = vld [vmem:[#allocation5 + $0x18] sm:$0xf]  ;;  %v841_v38 = vld [vmem:[#allocation5 + $0x38] sm:$0xf0] }
  0x1f   :  { %307 = vmatpush.bf16.msra.mxu2 %v720_v54  ;;  %320 = vmatpush.bf16.msra.mxu3 %v724_v55  ;;  %v776_v36 = vor.u32 %v846_v30, %v773_v33  ;;  %v837_v39 = vld [vmem:[#allocation5 + $0x1c] sm:$0xf]  ;;  %v737_v41 = vld [vmem:[#allocation5 + $0x3c] sm:$0xf0]  ;;  %v816_v44 = vor.u32 %v860_v35, %v815_v34  ;;  %v736_v47 = vor.u32 %v841_v38, %v735_v37  ;;  %v779_v50 = vld [vmem:[#allocation5 + $0x68] sm:$0xf] }
  0x20   :  { %v266_v18 = vsel %vm246_vm0, %v212_v16, 0  ;;  %v269_v19 = vsel %vm246_vm0, %v213_v17, 0  ;;  %v272_v40 = vsel %vm246_vm0, %v214_v31, 0  ;;  %v740_v48 = vor.u32 %v837_v39, %v737_v41  ;;  %v851_v51 = vld [vmem:[#allocation5 + $0x88] sm:$0xf0]  ;;  %s987_s23 = sld [smem:[#allocation2 + $0x2]] }
  0x21   :  { %817 = vmatmul.msk.bf16.vlgmr.msra.gmra.mxu0 %vm242_vm1, %v948_v58  ;;  %818 = vmatmul.msk.bf16.vlgmr.msra.gmra.mxu1 %vm242_vm1, %v948_v58  ;;  %v780_v52 = vor.u32 %v851_v51, %v779_v50  ;;  %v743_v53 = vld [vmem:[#allocation5 + $0x20] sm:$0xf]  ;;  %v842_v54 = vld [vmem:[#allocation5 + $0x40] sm:$0xf0]  ;;  %s989_s24 = sld [smem:[#allocation2 + $0x3]]  ;;  %s449_s9 = smul.f32 0.0, %s985_s1 }
  0x22   :  { %330 = vmatpush.bf16.msrb.mxu0 %v260_v59  ;;  %343 = vmatpush.bf16.msrb.mxu1 %v263_v60  ;;  %v744_v1 = vor.u32 %v842_v54, %v743_v53  ;;  %s991_s25 = sld [smem:[#allocation2]] }
  0x23   :  { %819 = vmatmul.msk.bf16.vlgmr.msra.gmra.mxu2 %vm242_vm1, %v948_v58  ;;  %820 = vmatmul.msk.bf16.vlgmr.msra.gmra.mxu3 %vm242_vm1, %v948_v58  ;;  %s993_s26 = sld [smem:[#allocation2 + $0x5]] }
  0x24   :  { %356 = vmatpush.bf16.msrb.mxu2 %v266_v18  ;;  %369 = vmatpush.bf16.msrb.mxu3 %v269_v19  ;;  %s431_s27 = ssub.f32 0.0, %s985_s1 }
  0x25   :  { %s996_s28 = sld [smem:[#allocation2 + $0x4]] }
  0x26   :  { %331 = vmatpush.bf16.msrb.mxu0 %v800_v63  ;;  %344 = vmatpush.bf16.msrb.mxu1 %v804_v0  ;;  %s1001_s4 = smul.f32 0.0, %s987_s23 }
  0x27   :  { %s436_s29 = smul.f32 0.0, %s989_s24  ;;  %s432_s30 = ssub.f32 0.0, %s989_s24 }
  0x28   :  { %357 = vmatpush.bf16.msrb.mxu2 %v808_v22  ;;  %370 = vmatpush.bf16.msrb.mxu3 %v812_v25  ;;  %s1007_s5 = smul.f32 0.0, %s431_s27  ;;  %s1029_s16 = sadd.f32 %s449_s9, %s991_s25 }
  0x29   :  { %s1010_s6 = ssub.f32 0.0, %s993_s26  ;;  %s440_s7 = smul.f32 0.0, %s991_s25 }
  0x2a   :  { %332 = vmatpush.bf16.msrb.mxu0 %v764_v5  ;;  %345 = vmatpush.bf16.msrb.mxu1 %v768_v6  ;;  %s1014_s8 = sadd.f32 %s987_s23, %s436_s29  ;;  %s1017_s10 = smul.f32 0.0, %s432_s30 }
  0x2b   :  { %s1020_s11 = sadd.f32 %s1001_s4, %s432_s30  ;;  %s442_s12 = smul.f32 %s989_s24, %s985_s1 }
  0x2c   :  { %358 = vmatpush.bf16.msrb.mxu2 %v772_v32  ;;  %371 = vmatpush.bf16.msrb.mxu3 %v776_v36  ;;  %s466_s13 = smul.f32 0.0, %s1010_s6  ;;  %s441_s14 = sadd.f32 %s440_s7, %s1001_s4 }
  0x2d   :  { %s464_s15 = smul.f32 %s996_s28, %s1014_s8  ;;  %s458_s17 = sadd.f32 %s1017_s10, %s440_s7 }
  0x2e   :  { %333 = vmatpush.bf16.msrb.mxu0 %v728_v11  ;;  %346 = vmatpush.bf16.msrb.mxu1 %v732_v12  ;;  %s459_s18 = smul.f32 %s987_s23, %s985_s1  ;;  %s445_s19 = sadd.f32 %s1007_s5, %s1001_s4 }
  0x2f   :  { %s446_s20 = smul.f32 %s989_s24, %s991_s25  ;;  %s1044_s22 = sadd.f32 %s442_s12, %s441_s14 }
  0x30   :  { %359 = vmatpush.bf16.msrb.mxu2 %v736_v47  ;;  %372 = vmatpush.bf16.msrb.mxu3 %v740_v48  ;;  %s468_s21 = smul.f32 0.0, %s1020_s11  ;;  %s467_s0 = sadd.f32 %s466_s13, %s464_s15 }
  0x31   :  { %821 = vmatmul.msk.bf16.vlgmr.msrb.gmra.mxu0 %vm242_vm1, %v948_v58  ;;  %822 = vmatmul.msk.bf16.vlgmr.msrb.gmra.mxu1 %vm242_vm1, %v948_v58  ;;  %s472_s2 = smul.f32 %s1029_s16, %s1010_s6  ;;  %s1051_s30 = sadd.f32 %s459_s18, %s458_s17 }
  0x32   :  { %382 = vmatpush.bf16.msra.mxu0 %v272_v40  ;;  %s482_s29 = smul.f32 %s993_s26, %s1014_s8  ;;  %s1054_s4 = sadd.f32 %s446_s20, %s445_s19 }
  0x33   :  { %823 = vmatmul.msk.bf16.vlgmr.msrb.gmra.mxu2 %vm242_vm1, %v948_v58  ;;  %824 = vmatmul.msk.bf16.vlgmr.msrb.gmra.mxu3 %vm242_vm1, %v948_v58  ;;  %s484_s24 = smul.f32 0.0, %s996_s28  ;;  %s1060_s12 = sadd.f32 %s440_s7, %s431_s27 }
  0x34   :  { %s470_s9 = smul.f32 %s996_s28, %s1044_s22  ;;  %s461_s13 = sadd.f32 %s1017_s10, %s1007_s5 }
  0x35   :  { %s462_s14 = smul.f32 %s987_s23, %s991_s25  ;;  %s1075_s17 = sadd.f32 %s468_s21, %s467_s0 }
  0x36   :  { %383 = vmatpush.bf16.msra.mxu0 %v816_v44  ;;  %s487_s15 = smul.f32 %s993_s26, %s1044_s22  ;;  %s473_s27 = sadd.f32 %s472_s2, %s470_s9 }
  0x37   :  { %s474_s1 = smul.f32 0.0, %s1051_s30  ;;  %s1082_s23 = sadd.f32 %s462_s14, %s461_s13 }
  0x38   :  { %s476_s5 = smul.f32 %s996_s28, %s1054_s4  ;;  %s1088_s10 = sld [smem:[#allocation2 + $0x6]] }
  0x39   :  { %s478_s25 = smul.f32 %s1060_s12, %s1010_s6  ;;  %s1092_s18 = sadd.f32 %s484_s24, %s482_s29 }
  0x3a   :  { %384 = vmatpush.bf16.msra.mxu0 %v780_v52  ;;  %s489_s7 = smul.f32 %s996_s28, %s1029_s16  ;;  %s1101_s20 = sadd.f32 %s474_s1, %s473_s27 }
  0x3b   :  { %s492_s19 = smul.f32 %s993_s26, %s1054_s4  ;;  %s479_s6 = sadd.f32 %s478_s25, %s476_s5 }
  0x3c   :  { %s494_s0 = smul.f32 %s996_s28, %s1060_s12  ;;  %s490_s29 = sadd.f32 %s489_s7, %s487_s15  ;;  %v630_v53 = vstv %s1101_s20 }
  0x3d   :  { %s480_s2 = smul.f32 0.0, %s1082_s23  ;;  %s1113_s28 = sld [smem:[#allocation2 + $0x7]] }
  0x3e   :  { %385 = vmatpush.bf16.msra.mxu0 %v744_v1  ;;  %s501_s26 = smul.f32 0.0, %s1044_s22  ;;  %s495_s9 = sadd.f32 %s494_s0, %s492_s19 }
  0x3f   :  { %s503_s24 = smul.f32 0.0, %s1029_s16  ;;  %s1126_s13 = sadd.f32 %s480_s2, %s479_s6 }
  0x40   :  { %s506_s14 = smul.f32 0.0, %s1054_s4  ;;  %s1136_s16 = sadd.f32 %s1092_s18, %s468_s21 }
  0x41   :  { %825 = vmatmul.msk.bf16.vlgmr.msra.gmra.mxu0 %vm242_vm1, %v948_v58  ;;  %s508_s15 = smul.f32 0.0, %s1060_s12  ;;  %s1145_s5 = sadd.f32 %s490_s29, %s474_s1  ;;  %v640_v54 = vstv %s1126_s13 }
  0x42   :  { %s497_s27 = smul.f32 0.0, %s1014_s8  ;;  %s1151_s21 = sadd.f32 %s495_s9, %s480_s2 }
  0x43   :  { %s1156_s8 = sadd.f32 %s503_s24, %s501_s26 }
  0x44   :  { %s1166_s12 = sadd.f32 %s508_s15, %s506_s14 }
  0x45   :  { %s1170_s22 = sadd.f32 %s497_s27, %s1020_s11 }
  0x46   :  { %s1174_s4 = sld [smem:[#allocation2 + $0x8]] }
  0x47   :  { %s505_s1 = sadd.f32 %s1156_s8, %s1051_s30 }
  0x48   :  { %s510_s11 = sadd.f32 %s1166_s12, %s1082_s23 }
  0x9e   :  { %v283_v42 = vpop.f32.mrf.mxu0  ;;  %v296_v43 = vpop.f32.mrf.mxu1 }
  0x9f   :  { %v392_v45 = vsel %vm391_vm2, %v283_v42, inf  ;;  %v393_v46 = vsel %vm391_vm2, %v296_v43, inf  ;;  %v397_v55 = vsel %vm391_vm2, %v283_v42, -inf  ;;  %v398_v56 = vsel %vm391_vm2, %v296_v43, -inf }
  0xa0   :  { %v394_v49 = vmin.f32 %v392_v45, %v393_v46  ;;  %v399_v2 = vmax.f32 %v397_v55, %v398_v56  ;;  %v619_v46 = vstv %s1075_s17  ;;  %v650_v55 = vstv %s1088_s10 }
  0xa2   :  { %395 = vmin.xlane.f32.xlu0 %v394_v49 }
  0xa6   :  { %v309_v57 = vpop.f32.mrf.mxu2  ;;  %v322_v59 = vpop.f32.mrf.mxu3 }
  0xa7   :  { %v285_v60 = vpop.f32.mrf.mxu0  ;;  %v298_v61 = vpop.f32.mrf.mxu1  ;;  %v402_v62 = vsel %vm391_vm2, %v309_v57, inf  ;;  %v403_v63 = vsel %vm391_vm2, %v322_v59, inf  ;;  %v407_v3 = vsel %vm391_vm2, %v309_v57, -inf  ;;  %v408_v4 = vsel %vm391_vm2, %v322_v59, -inf }
  0xa8   :  { %v404_v0 = vmin.f32 %v402_v62, %v403_v63  ;;  %v409_v7 = vmax.f32 %v407_v3, %v408_v4  ;;  %v622_v63 = vstv %s1136_s16  ;;  %v643_v4 = vstv %s1151_s21 }
  0xaa   :  { %405 = vmin.xlane.f32.xlu1 %v404_v0  ;;  %400 = vmax.xlane.f32.xlu0 %v399_v2  ;;  %v633_v0 = vstv %s1145_s5 }
  0xae   :  { %v311_v5 = vpop.f32.mrf.mxu2  ;;  %v324_v6 = vpop.f32.mrf.mxu3 }
  0xaf   :  { %v335_v8 = vpop.f32.mrf.mxu0  ;;  %v348_v9 = vpop.f32.mrf.mxu1 }
  0xb0   :  { %v412_v10 = vsel %vm391_vm2, %v335_v8, inf  ;;  %v413_v11 = vsel %vm391_vm2, %v348_v9, inf  ;;  %v417_v13 = vsel %vm391_vm2, %v335_v8, -inf  ;;  %v418_v14 = vsel %vm391_vm2, %v348_v9, -inf }
  0xb1   :  { %v414_v12 = vmin.f32 %v412_v10, %v413_v11  ;;  %v419_v17 = vmax.f32 %v417_v13, %v418_v14  ;;  %v653_v8 = vstv %s1113_s28 }
  0xb2   :  { %410 = vmax.xlane.f32.xlu1 %v409_v7 }
  0xb3   :  { %415 = vmin.xlane.f32.xlu2 %v414_v12 }
  0xb6   :  { %v1090_v27 = vpop.f32.mrf.mxu2  ;;  %v1097_v29 = vpop.f32.mrf.mxu3 }
  0xb7   :  { %v337_v15 = vpop.f32.mrf.mxu0  ;;  %v350_v16 = vpop.f32.mrf.mxu1 }
  0xb8   :  { %v625_v16 = vstv %s1170_s22 }
  0xbb   :  { %420 = vmax.xlane.f32.xlu2 %v419_v17 }
  0xbe   :  { %v363_v47 = vpop.f32.mrf.mxu2  ;;  %v376_v51 = vpop.f32.mrf.mxu3 }
  0xbf   :  { %v1106_v32 = vpop.f32.mrf.mxu0 }
  0xc7   :  { %v389_v56 = vpop.f32.mrf.mxu0 }
 0x115   :  { %v1003_v58 = vpop.xlane.xlu0 %395 }
 0x11d   :  { %v1031_v18 = vpop.xlane.xlu1 %405  ;;  %v401_v19 = vpop.xlane.xlu0 %400 }
 0x11e   :  { %v1041_v20 = vsub.f32 %v401_v19, %v1003_v58  ;;  %v1122_v40 = vadd.f32 %v401_v19, %v1003_v58 }
 0x120   :  { %865 = vrcp.f32 %v1041_v20  ;;  %v524_v28 = vand.u32 2147483648, %v1041_v20  ;;  %v522_v31 = vand.u32 2147483647, %v1041_v20  ;;  %vm518_vm4 = vweird.f32 %v1041_v20 }
 0x121   :  { %v571_v52 = vmul.f32 0.5, %v1122_v40  ;;  %v570_v57 = vmul.f32 0.5, %v1041_v20 }
 0x122   :  { %v525_v36 = vor.u32 1.1754944e-38, %v524_v28  ;;  %vm523_vm6 = vcmp.eq.f32.partialorder %v522_v31, 8.507059e+37  ;;  %v1199_v28 = vstv %s510_s11 }
 0x123   :  { %v1177_v5 = vmul.f32 0.0, %v571_v52  ;;  %v1183_v9 = vmul.f32 -1.0, %v571_v52  ;;  %v580_v11 = vmul.f32 0.0, %v570_v57 }
 0x125   :  { %v411_v21 = vpop.xlane.xlu1 %410 }
 0x126   :  { %v1069_v22 = vsub.f32 %v411_v21, %v1031_v18  ;;  %v1071_v23 = vpop.xlane.xlu2 %415  ;;  %v866_v24 = vpop.eup %865  ;;  %v546_v45 = vadd.f32 %v411_v21, %v1031_v18 }
 0x127   :  { %v514_v25 = vmul.f32 %v866_v24, %v1041_v20  ;;  %vm519_vm3 = vweird.f32 %v866_v24  ;;  %v511_v43 = vmul.f32 2.0, %v1071_v23 }
 0x128   :  { %867 = vrcp.f32 %v1069_v22  ;;  %vm520_vm5 = vmor %vm518_vm4, %vm519_vm3  ;;  %v542_v44 = vand.u32 2147483648, %v1069_v22  ;;  %v540_v49 = vand.u32 2147483647, %v1069_v22  ;;  %vm536_vm8 = vweird.f32 %v1069_v22 }
 0x129   :  { %v515_v26 = vsub.f32 1.0, %v514_v25  ;;  %v572_v60 = vmul.f32 0.5, %v1069_v22  ;;  %v573_v62 = vmul.f32 0.5, %v546_v45 }
 0x12a   :  { %v543_v61 = vor.u32 1.1754944e-38, %v542_v44  ;;  %vm541_vm10 = vcmp.eq.f32.partialorder %v540_v49, 8.507059e+37 }
 0x12b   :  { %v516_v30 = vmul.f32 %v866_v24, %v515_v26  ;;  %v600_v12 = vmul.f32 0.0, %v572_v60  ;;  %v1187_v13 = vmul.f32 0.0, %v573_v62  ;;  %v1189_v14 = vmul.f32 -1.0, %v573_v62 }
 0x12c   :  { %v1197_v26 = vstv %s505_s1 }
 0x12d   :  { %v517_v34 = vadd.f32 %v866_v24, %v516_v30 }
 0x12e   :  { %v868_v33 = vpop.eup %867  ;;  %v1110_v35 = vpop.xlane.xlu2 %420 }
 0x12f   :  { %v532_v37 = vmul.f32 %v868_v33, %v1069_v22  ;;  %v1118_v38 = vsub.f32 %v1110_v35, %v1071_v23  ;;  %v521_v39 = vsel %vm520_vm5, %v866_v24, %v517_v34  ;;  %vm537_vm7 = vweird.f32 %v868_v33 }
 0x130   :  { %v1129_v41 = vsel %vm523_vm6, %v525_v36, %v521_v39  ;;  %vm538_vm9 = vmor %vm536_vm8, %vm537_vm7  ;;  %v566_v22 = vmul.f32 2.0, %v1110_v35  ;;  %v548_v31 = vadd.f32 %v1110_v35, %v1071_v23 }
 0x131   :  { %v533_v42 = vsub.f32 1.0, %v532_v37  ;;  %869 = vrcp.f32 %v1118_v38  ;;  %v527_v50 = vmul.f32 %v1129_v41, %v511_v43  ;;  %v561_v19 = vand.u32 2147483648, %v1118_v38 }
 0x132   :  { %v559_v21 = vand.u32 2147483647, %v1118_v38  ;;  %v529_v24 = vmul.f32 %v1122_v40, %v1129_v41  ;;  %vm555_vm12 = vweird.f32 %v1118_v38  ;;  %v567_v41 = vmul.f32 %v566_v22, %v1071_v23 }
 0x133   :  { %v534_v48 = vmul.f32 %v868_v33, %v533_v42  ;;  %v598_v3 = vmul.f32 0.0, %v527_v50  ;;  %v574_v17 = vmul.f32 %v570_v57, %v527_v50  ;;  %v562_v39 = vor.u32 1.1754944e-38, %v561_v19 }
 0x134   :  { %vm560_vm14 = vcmp.eq.f32.partialorder %v559_v21, 8.507059e+37  ;;  %v656_v42 = vstv %s1174_s4  ;;  %v586_v35 = vmul.f32 %v570_v57, %v529_v24 }
 0x135   :  { %v535_v59 = vadd.f32 %v868_v33, %v534_v48  ;;  %v601_v18 = vadd.f32 %v600_v12, %v598_v3  ;;  %v579_v34 = vadd.f32 %v1177_v5, %v574_v17 }
 0x137   :  { %v870_v1 = vpop.eup %869  ;;  %v539_v2 = vsel %vm538_vm9, %v868_v33, %v535_v59  ;;  %v604_v37 = vadd.f32 %v1187_v13, %v601_v18  ;;  %v620_v23 = vmul.f32 %v619_v46, %v579_v34  ;;  %v631_v52 = vmul.f32 %v630_v53, %v579_v34 }
 0x138   :  { %v544_v6 = vsel %vm541_vm10, %v543_v61, %v539_v2  ;;  %v551_v7 = vmul.f32 %v870_v1, %v1118_v38  ;;  %vm556_vm11 = vweird.f32 %v870_v1  ;;  %v609_v38 = vmul.f32 0.0, %v529_v24 }
 0x139   :  { %v545_v10 = vmul.f32 %v544_v6, %v511_v43  ;;  %v547_v30 = vmul.f32 %v546_v45, %v544_v6  ;;  %vm557_vm13 = vmor %vm555_vm12, %vm556_vm11  ;;  %v660_v51 = vmul.f32 %v619_v46, %v604_v37  ;;  %v668_v59 = vmul.f32 %v630_v53, %v604_v37 }
 0x13a   :  { %v552_v15 = vsub.f32 1.0, %v551_v7  ;;  %v675_v2 = vmul.f32 %v640_v54, %v604_v37  ;;  %v682_v22 = vmul.f32 %v650_v55, %v604_v37 }
 0x13b   :  { %v582_v58 = vmul.f32 0.0, %v545_v10  ;;  %v605_v25 = vmul.f32 %v572_v60, %v545_v10  ;;  %v588_v45 = vmul.f32 0.0, %v547_v30  ;;  %v611_v47 = vmul.f32 %v572_v60, %v547_v30 }
 0x13c   :  { %v553_v20 = vmul.f32 %v870_v1, %v552_v15  ;;  %v641_v60 = vmul.f32 %v640_v54, %v579_v34 }
 0x13d   :  { %v583_v36 = vadd.f32 %v582_v58, %v580_v11  ;;  %v608_v43 = vadd.f32 %v605_v25, %v1187_v13  ;;  %v589_v46 = vadd.f32 %v588_v45, %v586_v35  ;;  %v612_v3 = vadd.f32 %v611_v47, %v609_v38 }
 0x13e   :  { %v554_v33 = vadd.f32 %v870_v1, %v553_v20 }
 0x13f   :  { %v585_v50 = vadd.f32 %v583_v36, %v1177_v5  ;;  %v662_v61 = vmul.f32 %v622_v63, %v608_v43  ;;  %v670_v62 = vmul.f32 %v633_v0, %v608_v43  ;;  %v677_v17 = vmul.f32 %v643_v4, %v608_v43 }
 0x140   :  { %v558_v40 = vsel %vm557_vm13, %v870_v1, %v554_v33  ;;  %v651_v1 = vmul.f32 %v650_v55, %v579_v34  ;;  %v684_v24 = vmul.f32 %v653_v8, %v608_v43 }
 0x141   :  { %v563_v44 = vsel %vm560_vm14, %v562_v39, %v558_v40  ;;  %v623_v10 = vmul.f32 %v622_v63, %v585_v50  ;;  %v634_v53 = vmul.f32 %v633_v0, %v585_v50  ;;  %v644_v15 = vmul.f32 %v643_v4, %v585_v50 }
 0x142   :  { %v564_v48 = vmul.f32 %v563_v44, %v548_v31  ;;  %v568_v49 = vmul.f32 %v567_v41, %v563_v44  ;;  %v663_v20 = vadd.f32 %v662_v61, %v660_v51  ;;  %v671_v21 = vadd.f32 %v670_v62, %v668_v59 }
 0x143   :  { %v624_v30 = vadd.f32 %v623_v10, %v620_v23  ;;  %v635_v31 = vadd.f32 %v634_v53, %v631_v52  ;;  %v678_v33 = vadd.f32 %v677_v17, %v675_v2  ;;  %v645_v36 = vadd.f32 %v644_v15, %v641_v60 }
 0x144   :  { %v565_v56 = vsub.f32 0.0, %v564_v48  ;;  %v569_v57 = vsub.f32 0.0, %v568_v49  ;;  %v685_v47 = vadd.f32 %v684_v24, %v682_v22 }
 0x146   :  { %v590_v6 = vmul.f32 0.0, %v565_v56  ;;  %v595_v7 = vmul.f32 0.0, %v569_v57 }
 0x148   :  { %v591_v58 = vadd.f32 %v590_v6, %v589_v46  ;;  %v596_v18 = vadd.f32 %v595_v7, %v580_v11  ;;  %v613_v19 = vadd.f32 %v612_v3, %v590_v6  ;;  %v617_v54 = vadd.f32 %v600_v12, %v595_v7 }
 0x149   :  { %v654_v11 = vmul.f32 %v653_v8, %v585_v50 }
 0x14a   :  { %v593_v63 = vadd.f32 %v1183_v9, %v591_v58  ;;  %v615_v0 = vadd.f32 %v1189_v14, %v613_v19  ;;  %v597_v25 = vadd.f32 %v596_v18, %v1177_v5  ;;  %v618_v4 = vadd.f32 %v617_v54, %v1187_v13 }
 0x14b   :  { %v655_v23 = vadd.f32 %v654_v11, %v651_v1 }
 0x14c   :  { %v626_v12 = vmul.f32 %v625_v16, %v593_v63  ;;  %v628_v34 = vmul.f32 0.0, %v597_v25  ;;  %v664_v55 = vmul.f32 %v625_v16, %v615_v0  ;;  %v666_v37 = vmul.f32 0.0, %v618_v4 }
 0x14d   :  { %v637_v9 = vmul.f32 %v1197_v26, %v593_v63  ;;  %v672_v14 = vmul.f32 %v1197_v26, %v615_v0  ;;  %v647_v5 = vmul.f32 %v1199_v28, %v593_v63  ;;  %v657_v40 = vmul.f32 %v656_v42, %v593_v63 }
 0x14e   :  { %v627_v39 = vadd.f32 %v626_v12, %v624_v30  ;;  %v665_v13 = vadd.f32 %v664_v55, %v663_v20  ;;  %v679_v41 = vmul.f32 %v1199_v28, %v615_v0  ;;  %v686_v43 = vmul.f32 %v656_v42, %v615_v0 }
 0x14f   :  { %v638_v8 = vadd.f32 %v637_v9, %v635_v31  ;;  %v673_v35 = vadd.f32 %v672_v14, %v671_v21  ;;  %v648_v38 = vadd.f32 %v647_v5, %v645_v36  ;;  %v658_v57 = vadd.f32 %v657_v40, %v655_v23 }
 0x150   :  { %v629_v44 = vadd.f32 %v628_v34, %v627_v39  ;;  %v667_v45 = vadd.f32 %v666_v37, %v665_v13  ;;  %v680_v16 = vadd.f32 %v679_v41, %v678_v33  ;;  %v687_v59 = vadd.f32 %v686_v43, %v685_v47 }
 0x151   :  { %v639_v48 = vadd.f32 %v638_v8, %v628_v34  ;;  %v674_v49 = vadd.f32 %v673_v35, %v666_v37  ;;  %v649_v50 = vadd.f32 %v648_v38, %v628_v34  ;;  %v659_v2 = vadd.f32 %v658_v57, %v597_v25 }
 0x152   :  { %v689_v26 = vmul.f32 %v629_v44, %v1090_v27  ;;  %v696_v51 = vmul.f32 %v667_v45, %v1090_v27  ;;  %v681_v52 = vadd.f32 %v680_v16, %v666_v37  ;;  %v688_v46 = vadd.f32 %v687_v59, %v618_v4 }
 0x153   :  { %v690_v56 = vmul.f32 %v639_v48, %v1097_v29  ;;  %v697_v28 = vmul.f32 %v674_v49, %v1097_v29  ;;  %v692_v61 = vmul.f32 %v649_v50, %v1106_v32 }
 0x154   :  { %v699_v62 = vmul.f32 %v681_v52, %v1106_v32 }
 0x155   :  { %v691_v42 = vadd.f32 %v690_v56, %v689_v26  ;;  %v698_v60 = vadd.f32 %v697_v28, %v696_v51 }
 0x157   :  { %v693_v1 = vadd.f32 %v692_v61, %v691_v42  ;;  %v700_v3 = vadd.f32 %v699_v62, %v698_v60 }
 0x159   :  { %v694_v6 = vadd.f32 %v693_v1, %v659_v2  ;;  %v701_v7 = vadd.f32 %v700_v3, %v688_v46 }
 0x15b   :  { %695 = vst [vmem:[%s1269_s3] sm:$0x1] %v694_v6 }
 0x15c   :  { %702 = vst [vmem:[%s1269_s3 + $0x1] sm:$0x1] %v701_v7 }
 0x15d   :  { %707 = vsyncpa [#allocation3], 1 }
 0x15e   :  { %708 = vsyncpa [#allocation4], 1 }

</bundles_post_ra>
